<compile_context>
chip_gen: v7x
topology: tpu7x:2x2x1
jax: 0.10.0
libtpu: 0.0.40
codegen_flags: <defaults>
</compile_context>

<pallas_src>
import jax
import jax.numpy as jnp
from jax.experimental import pallas as pl
from jax.experimental.pallas import tpu as pltpu


OUT_PAD = 128          # lane-dense output width (multiple of 128 -> unmasked stores)
MAX_BATCH_TILE = 2048  # big tiles amortize per-grid-step overhead; footprint at
                       # TB=2048 (z f32 + bf16 out + f32 intermediates, double
                       # buffered) stays well under the 32 MiB scoped VMEM limit
                       # on every generation (v7x physical VMEM is 64 MiB).


def _round_up(x, m):
    return (x + m - 1) // m * m


# ----------------------------------------------------------------------------
# Pallas kernel: all property-MLP heads fused into one call
# ----------------------------------------------------------------------------
def _make_fused_property_mlp_kernel(nh_pad, out_pad):
    def kernel(z_ref, w1_ref, w2_ref, w3_ref, bm_ref, out_ref):
        # z_ref:   (TB, K)              f32    batch tile (ragged last block masked)
        # w1_ref:  (K, NH_pad)          bf16   stacked first-layer weights
        # w2_ref:  (NH_pad, NH_pad)     bf16   block-diagonal second-layer weights
        # w3_ref:  (NH_pad, OUT_PAD)    bf16   stacked + lane-padded final projection
        # bm_ref:  (4, C)               f32    rows = [b1, b2, b3, sigmoid-mask]
        # out_ref: (TB, OUT_PAD)        bf16   lane-dense output slab
        bm = bm_ref[...]
        b1 = bm[0:1, :nh_pad]
        b2 = bm[1:2, :nh_pad]
        b3 = bm[2:3, :out_pad]
        mask = bm[3:4, :out_pad]

        # in-kernel cast to the MXU-native bf16 (no wrapper-side HBM pass over z)
        z = z_ref[...].astype(jnp.bfloat16)
        h = jnp.dot(z, w1_ref[...], preferred_element_type=jnp.float32) + b1
        h = h * jax.nn.sigmoid(h)                                   # SiLU (f32)
        # nn.Dropout is the identity at inference time
        h = jnp.dot(h.astype(jnp.bfloat16), w2_ref[...],
                    preferred_element_type=jnp.float32) + b2
        h = h * jax.nn.sigmoid(h)                                   # SiLU (f32)
        s = jnp.dot(h.astype(jnp.bfloat16), w3_ref[...],
                    preferred_element_type=jnp.float32) + b3
        # per-head final activation: Sigmoid for qed/sas, Identity otherwise
        out_ref[...] = jnp.where(mask != 0.0, jax.nn.sigmoid(s), s).astype(out_ref.dtype)

    return kernel


def fused_property_forward(z_flat, fused):
    """z_flat: (B, K) f32 -> (B, n_heads) f32 scores for all heads in one call."""
    B, K = z_flat.shape
    n_heads = fused["n_heads"]
    nh_pad = fused["nh_pad"]

    # Batch tile: as large as possible (overhead amortization) but capped so a
    # large B produces >= ~4 grid steps -> "parallel" axis actually feeds both
    # TensorCores on v7x.  Rounded to 16 sublanes.
    TB = min(MAX_BATCH_TILE, _round_up(pl.cdiv(B, 4), 16))
    grid = (pl.cdiv(B, TB),)   # Pallas masks the ragged last block (reads padded,
                               # writes clipped), so no wrapper-side jnp.pad of z.

    kernel = _make_fused_property_mlp_kernel(nh_pad, OUT_PAD)
    out = pl.pallas_call(
        kernel,
        out_shape=jax.ShapeDtypeStruct((B, OUT_PAD), jnp.bfloat16),
        grid_spec=pltpu.PrefetchScalarGridSpec(
            num_scalar_prefetch=0,
            grid=grid,
            in_specs=[
                pl.BlockSpec((TB, K), lambda i: (i, 0)),                  # z tile
                pl.BlockSpec(fused["w1"].shape, lambda i: (0, 0)),         # resident
                pl.BlockSpec(fused["w2"].shape, lambda i: (0, 0)),
                pl.BlockSpec(fused["w3"].shape, lambda i: (0, 0)),
                pl.BlockSpec(fused["bm"].shape, lambda i: (0, 0)),         # biases+mask
            ],
            out_specs=pl.BlockSpec((TB, OUT_PAD), lambda i: (i, 0)),
        ),
        compiler_params=pltpu.CompilerParams(
            dimension_semantics=("parallel",),        # shard batch axis across TCs
            vmem_limit_bytes=32 * 1024 * 1024,        # safe on v7x (64 MiB physical)
        ),
    )(z_flat, fused["w1"], fused["w2"], fused["w3"], fused["bm"])
    return out[:, :n_heads].astype(jnp.float32)


# ----------------------------------------------------------------------------
# Deterministic parameter construction (synthetic init, no checkpoint load)
# ----------------------------------------------------------------------------
def _init_linear(key, in_dim, out_dim):
    kw, kb = jax.random.split(key)
    bound = 1.0 / jnp.sqrt(jnp.float32(in_dim))
    # stored transposed: (in, out), so the kernel does x @ W + b
    w = jax.random.uniform(kw, (in_dim, out_dim), jnp.float32, -bound, bound)
    b = jax.random.uniform(kb, (1, out_dim), jnp.float32, -bound, bound)
    return w, b


def _init_mlp_params(key, prior_dim, hidden_dim):
    k1, k2, k3 = jax.random.split(key, 3)
    w1, b1 = _init_linear(k1, prior_dim, hidden_dim)
    w2, b2 = _init_linear(k2, hidden_dim, hidden_dim)
    w3, b3 = _init_linear(k3, hidden_dim, 1)
    return {"w1": w1, "b1": b1, "w2": w2, "b2": b2, "w3": w3, "b3": b3}


def _build_fused_heads(head_names, heads, prior_dim, hidden_dim):
    """Stack all per-head MLP params into fused weights for one kernel call."""
    n_heads = len(head_names)
    H = hidden_dim
    NH = n_heads * H
    NH_pad = _round_up(NH, 128)        # lane-dense intermediates
    C = max(NH_pad, OUT_PAD)

    w1 = jnp.zeros((prior_dim, NH_pad), jnp.float32)   # stacked first layer
    # TODO(synk): for n_heads*H >> 128 switch layer 2 to a per-head grouped matmul
    # (extra grid axis over heads); the dense block-diag wastes MXU flops ~ n_heads^2.
    w2 = jnp.zeros((NH_pad, NH_pad), jnp.float32)      # block-diagonal second layer
    w3 = jnp.zeros((NH_pad, OUT_PAD), jnp.float32)     # stacked + lane-padded
    bm = jnp.zeros((4, C), jnp.float32)                # rows: b1, b2, b3, sigmoid-mask

    for idx, p in enumerate(head_names):
        prm = heads[p]["params"]
        lo, hi = idx * H, (idx + 1) * H
        w1 = w1.at[:, lo:hi].set(prm["w1"])
        w2 = w2.at[lo:hi, lo:hi].set(prm["w2"])
        w3 = w3.at[lo:hi, idx].set(prm["w3"][:, 0])
        bm = bm.at[0, lo:hi].set(prm["b1"][0])
        bm = bm.at[1, lo:hi].set(prm["b2"][0])
        bm = bm.at[2, idx].set(prm["b3"][0, 0])
        if heads[p]["use_sigmoid"]:
            bm = bm.at[3, idx].set(1.0)

    return {
        "n_heads": n_heads,
        "nh_pad": NH_pad,
        # matmul operands in bf16 (MXU-native on v5e/v6e/v7x); no int8 (v7x has none)
        "w1": w1.astype(jnp.bfloat16),
        "w2": w2.astype(jnp.bfloat16),
        "w3": w3.astype(jnp.bfloat16),
        # biases / mask stay f32 (added to the f32 MXU accumulator; v5e VPU is f32)
        "bm": bm,
    }


# ----------------------------------------------------------------------------
# JAX/Pallas counterpart of LatentPromptTransformer (defined parts only)
# ----------------------------------------------------------------------------
class LatentPromptTransformerPallas:
    def __init__(self, key, *, n_latent=4, latent_dim=16, mlp_hidden_dim=32,
                 mol_properties=("qed", "logp")):
        self.n_latent = n_latent
        self.latent_dim = latent_dim
        self.channel = 1
        self.prior_dim = n_latent * latent_dim
        self.mlp_hidden_dim = mlp_hidden_dim
        self.head_names = tuple(mol_properties)

        self.property_mlps = {}
        keys = jax.random.split(key, len(self.head_names))
        for p, k in zip(self.head_names, keys):
            self.property_mlps[p] = {
                "params": _init_mlp_params(k, self.prior_dim, mlp_hidden_dim),
                "use_sigmoid": p in ("qed", "sas"),
            }
        # fuse every head into one set of stacked weights -> one pallas_call
        self.fused_heads = _build_fused_heads(
            self.head_names, self.property_mlps, self.prior_dim, mlp_hidden_dim)

    def unet_forward(self, z):
        # z: (B, channel * n_latent, latent_dim)
        b = z.shape[0]
        z = z.reshape(-1, self.channel, self.latent_dim)
        # TODO(synk): Unet1D(dim=16, channels=1, dim_mults=(1,2,4,8)) is an
        # external module whose definition was not provided; its 1-D conv
        # stack is not reproduced here (shape-preserving, so reshapes match).
        z = z.reshape(b, self.n_latent * self.channel, self.latent_dim)
        return z

    def property_scores(self, z_prior):
        """All MLP heads in one fused Pallas call -> {prop: score}."""
        b = z_prior.shape[0]
        z_flat = z_prior.reshape(b, -1)                     # torch z.view(b, -1)
        scores = fused_property_forward(z_flat, self.fused_heads)   # (B, n_heads) f32
        # torch `.squeeze()` semantics (collapses to 0-d when B == 1, as in the spec)
        return {p: jnp.squeeze(scores[:, i])
                for i, p in enumerate(self.head_names)}

    def property_score(self, prop, z_prior):
        return self.property_scores(z_prior)[prop]

    def forward(self, x, z, targets=None, inference=False):
        z = self.unet_forward(z)
        # TODO(synk): GPT_CA_SF decoder transformer (self.dec_trans) is an
        # external module whose definition was not provided; logits/loss are
        # not computed here.
        logits, loss = None, None
        return logits, loss


# ----------------------------------------------------------------------------
# main
# ----------------------------------------------------------------------------
if __name__ == "__main__":
    key = jax.random.PRNGKey(0)
    k_model, k_z = jax.random.split(key)

    B, N_LATENT, LATENT_DIM, HIDDEN = 2, 4, 16, 32
    model = LatentPromptTransformerPallas(
        k_model, n_latent=N_LATENT, latent_dim=LATENT_DIM,
        mlp_hidden_dim=HIDDEN, mol_properties=("qed", "logp"))

    # z ~ sample_p_0: (B, channel * n_latent, latent_dim)
    z = jax.random.normal(k_z, (B, N_LATENT, LATENT_DIM), dtype=jnp.float32)

    z_prior = model.unet_forward(z)
    scores = model.property_scores(z_prior)
    scores = jax.block_until_ready(scores)

    # correctness check vs. pure-JAX f32 reference of each MLP head
    # (kernel uses bf16 matmul inputs + bf16 output slab -> relaxed tolerance)
    def ref_mlp(z_prior, params, use_sigmoid):
        zf = z_prior.reshape(z_prior.shape[0], -1)
        h = zf @ params["w1"] + params["b1"]
        h = h * jax.nn.sigmoid(h)
        h = h @ params["w2"] + params["b2"]
        h = h * jax.nn.sigmoid(h)
        s = h @ params["w3"] + params["b3"]
        if use_sigmoid:
            s = jax.nn.sigmoid(s)
        return jnp.squeeze(s)

    ok = True
    for p in model.head_names:
        head = model.property_mlps[p]
        ref = ref_mlp(z_prior, head["params"], head["use_sigmoid"])
        ok &= bool(jnp.allclose(scores[p], ref, atol=2e-2, rtol=2e-2))
        ok &= scores[p].shape == (B,)

    if ok:
        print("KERNEL_OK")
    else:
        print("KERNEL_MISMATCH")
</pallas_src>

<mosaic_0001>
module attributes {stable_mosaic.version = 11 : i64} {
  func.func @kernel(%arg0: i32, %arg1: memref<16x64xf32, #tpu.memory_space<vmem>>, %arg2: memref<64x128xbf16, #tpu.memory_space<vmem>>, %arg3: memref<128x128xbf16, #tpu.memory_space<vmem>>, %arg4: memref<128x128xbf16, #tpu.memory_space<vmem>>, %arg5: memref<4x128xf32, #tpu.memory_space<vmem>>, %arg6: memref<16x128xbf16, #tpu.memory_space<vmem>>) attributes {dimension_semantics = [#tpu.dimension_semantics<parallel>], iteration_bounds = array<i64: 1>, scalar_prefetch = 0 : i64, scratch_operands = 0 : i64, tpu.core_type = #tpu.core_type<tc>, window_params = [{transform_indices = @transform_0, window_bounds = array<i64: 16, 64>}, {pipeline_mode = #tpu.pipeline_mode<synchronous>, transform_indices = @transform_1, window_bounds = array<i64: 64, 128>}, {pipeline_mode = #tpu.pipeline_mode<synchronous>, transform_indices = @transform_2, window_bounds = array<i64: 128, 128>}, {pipeline_mode = #tpu.pipeline_mode<synchronous>, transform_indices = @transform_3, window_bounds = array<i64: 128, 128>}, {pipeline_mode = #tpu.pipeline_mode<synchronous>, transform_indices = @transform_4, window_bounds = array<i64: 4, 128>}, {transform_indices = @transform_5, window_bounds = array<i64: 16, 128>}]} {
    %c0 = arith.constant 0 : index
    %c0_0 = arith.constant 0 : index
    %0 = vector.load %arg5[%c0, %c0_0] : memref<4x128xf32, #tpu.memory_space<vmem>>, vector<4x128xf32>
    %1 = vector.extract_strided_slice %0 {offsets = [0, 0], sizes = [1, 128], strides = [1, 1]} : vector<4x128xf32> to vector<1x128xf32>
    %2 = vector.extract_strided_slice %0 {offsets = [1, 0], sizes = [1, 128], strides = [1, 1]} : vector<4x128xf32> to vector<1x128xf32>
    %3 = vector.extract_strided_slice %0 {offsets = [2, 0], sizes = [1, 128], strides = [1, 1]} : vector<4x128xf32> to vector<1x128xf32>
    %4 = vector.extract_strided_slice %0 {offsets = [3, 0], sizes = [1, 128], strides = [1, 1]} : vector<4x128xf32> to vector<1x128xf32>
    %c0_1 = arith.constant 0 : index
    %c0_2 = arith.constant 0 : index
    %5 = vector.load %arg1[%c0_1, %c0_2] : memref<16x64xf32, #tpu.memory_space<vmem>>, vector<16x64xf32>
    %6 = arith.truncf %5 : vector<16x64xf32> to vector<16x64xbf16>
    %c0_3 = arith.constant 0 : index
    %c0_4 = arith.constant 0 : index
    %7 = vector.load %arg2[%c0_3, %c0_4] : memref<64x128xbf16, #tpu.memory_space<vmem>>, vector<64x128xbf16>
    %cst = arith.constant dense<0.000000e+00> : vector<16x128xf32>
    %8 = tpu.matmul %6, %7, %cst {dimension_numbers = #tpu.dot_dimension_numbers<[1], [0], [0], [1], [0, 0, 1, 1], [], []>} : vector<16x64xbf16>, vector<64x128xbf16>, vector<16x128xf32> -> vector<16x128xf32>
    %9 = vector.broadcast %1 : vector<1x128xf32> to vector<16x128xf32>
    %10 = arith.addf %8, %9 : vector<16x128xf32>
    %11 = arith.negf %10 : vector<16x128xf32>
    %12 = math.exp %11 : vector<16x128xf32>
    %cst_5 = arith.constant 1.000000e+00 : f32
    %13 = vector.broadcast %cst_5 : f32 to vector<16x128xf32>
    %14 = arith.addf %13, %12 : vector<16x128xf32>
    %15 = arith.divf %13, %14 : vector<16x128xf32>
    %16 = arith.mulf %10, %15 : vector<16x128xf32>
    %17 = arith.truncf %16 : vector<16x128xf32> to vector<16x128xbf16>
    %c0_6 = arith.constant 0 : index
    %c0_7 = arith.constant 0 : index
    %18 = vector.load %arg3[%c0_6, %c0_7] : memref<128x128xbf16, #tpu.memory_space<vmem>>, vector<128x128xbf16>
    %cst_8 = arith.constant dense<0.000000e+00> : vector<16x128xf32>
    %19 = tpu.matmul %17, %18, %cst_8 {dimension_numbers = #tpu.dot_dimension_numbers<[1], [0], [0], [1], [0, 0, 1, 1], [], []>} : vector<16x128xbf16>, vector<128x128xbf16>, vector<16x128xf32> -> vector<16x128xf32>
    %20 = vector.broadcast %2 : vector<1x128xf32> to vector<16x128xf32>
    %21 = arith.addf %19, %20 : vector<16x128xf32>
    %22 = arith.negf %21 : vector<16x128xf32>
    %23 = math.exp %22 : vector<16x128xf32>
    %cst_9 = arith.constant 1.000000e+00 : f32
    %24 = vector.broadcast %cst_9 : f32 to vector<16x128xf32>
    %25 = arith.addf %24, %23 : vector<16x128xf32>
    %26 = arith.divf %24, %25 : vector<16x128xf32>
    %27 = arith.mulf %21, %26 : vector<16x128xf32>
    %28 = arith.truncf %27 : vector<16x128xf32> to vector<16x128xbf16>
    %c0_10 = arith.constant 0 : index
    %c0_11 = arith.constant 0 : index
    %29 = vector.load %arg4[%c0_10, %c0_11] : memref<128x128xbf16, #tpu.memory_space<vmem>>, vector<128x128xbf16>
    %cst_12 = arith.constant dense<0.000000e+00> : vector<16x128xf32>
    %30 = tpu.matmul %28, %29, %cst_12 {dimension_numbers = #tpu.dot_dimension_numbers<[1], [0], [0], [1], [0, 0, 1, 1], [], []>} : vector<16x128xbf16>, vector<128x128xbf16>, vector<16x128xf32> -> vector<16x128xf32>
    %31 = vector.broadcast %3 : vector<1x128xf32> to vector<16x128xf32>
    %32 = arith.addf %30, %31 : vector<16x128xf32>
    %cst_13 = arith.constant 0.000000e+00 : f32
    %33 = vector.broadcast %cst_13 : f32 to vector<1x128xf32>
    %34 = arith.cmpf one, %4, %33 : vector<1x128xf32>
    %35 = arith.negf %32 : vector<16x128xf32>
    %36 = math.exp %35 : vector<16x128xf32>
    %cst_14 = arith.constant 1.000000e+00 : f32
    %37 = vector.broadcast %cst_14 : f32 to vector<16x128xf32>
    %38 = arith.addf %37, %36 : vector<16x128xf32>
    %39 = arith.divf %37, %38 : vector<16x128xf32>
    %40 = vector.shape_cast %34 : vector<1x128xi1> to vector<1x128xi1>
    %41 = vector.broadcast %40 : vector<1x128xi1> to vector<16x128xi1>
    %42 = arith.select %41, %39, %32 : vector<16x128xi1>, vector<16x128xf32>
    %43 = arith.truncf %42 : vector<16x128xf32> to vector<16x128xbf16>
    %c0_15 = arith.constant 0 : index
    %c0_16 = arith.constant 0 : index
    %44 = vector.load %arg6[%c0_15, %c0_16] : memref<16x128xbf16, #tpu.memory_space<vmem>>, vector<16x128xbf16>
    tpu.vector_store %arg6[%c0_15, %c0_16], %43 {strides = array<i32>} : memref<16x128xbf16, #tpu.memory_space<vmem>>, vector<16x128xbf16>,
    return
  }
  func.func @transform_0(%arg0: i32) -> (i32, i32) {
    %c0_i32 = arith.constant 0 : i32
    %c0_i32_0 = arith.constant 0 : i32
    return %arg0, %c0_i32 : i32, i32
  }
  func.func @transform_1(%arg0: i32) -> (i32, i32) {
    %c0_i32 = arith.constant 0 : i32
    %c0_i32_0 = arith.constant 0 : i32
    %c0_i32_1 = arith.constant 0 : i32
    return %c0_i32, %c0_i32_0 : i32, i32
  }
  func.func @transform_2(%arg0: i32) -> (i32, i32) {
    %c0_i32 = arith.constant 0 : i32
    %c0_i32_0 = arith.constant 0 : i32
    %c0_i32_1 = arith.constant 0 : i32
    return %c0_i32, %c0_i32_0 : i32, i32
  }
  func.func @transform_3(%arg0: i32) -> (i32, i32) {
    %c0_i32 = arith.constant 0 : i32
    %c0_i32_0 = arith.constant 0 : i32
    %c0_i32_1 = arith.constant 0 : i32
    return %c0_i32, %c0_i32_0 : i32, i32
  }
  func.func @transform_4(%arg0: i32) -> (i32, i32) {
    %c0_i32 = arith.constant 0 : i32
    %c0_i32_0 = arith.constant 0 : i32
    %c0_i32_1 = arith.constant 0 : i32
    return %c0_i32, %c0_i32_0 : i32, i32
  }
  func.func @transform_5(%arg0: i32) -> (i32, i32) {
    %c0_i32 = arith.constant 0 : i32
    %c0_i32_0 = arith.constant 0 : i32
    return %arg0, %c0_i32 : i32, i32
  }
}

</mosaic_0001>

<bundles_post_ra>
// kernel: tpu_custom_call.1
= control target key start
LH: loop header
LB: loop body
LE: loop exit
PB: predicated region body
PF: predicated region fallthrough
CT: control target
= control target key end

     0   :  { %10 = vsyncpa [#allocation3], 0  ;;  %s964_s0 = inlined_call_operand.hbm [shape: f32[2,64], index: 0, kind: input, shape index: {}]   ;;  %s965_s1 = inlined_call_operand.hbm [shape: bf16[64,128], index: 1, kind: input, shape index: {}]   ;;  %s966_s2 = inlined_call_operand.hbm [shape: bf16[128,128], index: 2, kind: input, shape index: {}]   ;;  %s967_s3 = inlined_call_operand.hbm [shape: bf16[128,128], index: 3, kind: input, shape index: {}]   ;;  %s968_s4 = inlined_call_operand.vmem [shape: f32[4,128], index: 4, kind: input, shape index: {}]   ;;  %s969_s5 = inlined_call_operand.hbm [shape: bf16[2,128], index: 5, kind: output, shape index: {}]  }
   0x1   :  { %11 = vsyncpa [#allocation6], 0 }
   0x2   :  { %12 = vsyncpa [#allocation9], 0 }
   0x3   :  { %13 = vsyncpa [#allocation4], 0 }
   0x4   :  { %18 = vsyncadd [#allocation3], 224  ;;  %s801_s18 = smov [#allocation5]   ;;  %s683_s22 = scalar_lea.hbm %s965_s1, 512 }
   0x5   :  { %s31_s19 = sshll.u32 %s801_s18, 4  ;;  %p684_p0 = scmp.ne.s32.totalorder %s965_s1, %s683_s22  ;;  %s32_s19 = int_to_ptr.vmem [resolvable:$true] %s31_s19 }
   0x6   :  { %p687_p1 = scmp.lt.u32.totalorder %s683_s22, %s965_s1 }
   0x8   :  { %p689_p2 = pnand %p687_p1, %p684_p0 }
   0xa   :  { %692 = shalt.err (!%p689_p2)
}
   0xb   :  { %s693_s27 = scalar_lea.vmem %s32_s19, 512  ;;  %p698_p4 = scmp.lt.s32.totalorder %s32_s19, %s32_s19 }
   0xc   :  { %p694_p3 = scmp.ne.s32.totalorder %s32_s19, %s693_s27  ;;  %p699_p5 = scmp.lt.s32.totalorder %s693_s27, %s693_s27 }
   0xe   :  { %p700_p6 = por %p699_p5, %p698_p4 }
  0x10   :  { %p701_p7 = pnand %p700_p6, %p694_p3 }
  0x12   :  { %704 = shalt.err (!%p701_p7)
}
  0x13   :  { %s802_s28 = smov 64   ;;  %s803_s29 = smov 4  }
  0x14   :  { %37 = dma.hbm_to_vmem [thread:$0]  %s965_s1, 512, %s32_s19, [#allocation6], %s802_s28, %s802_s28, %s803_s29  }
  0x15   :  { %s804_s7 = smov [#allocation2]   ;;  %s705_s11 = scalar_lea.hbm %s964_s0, 32 }
  0x16   :  { %s19_s8 = sshll.u32 %s804_s7, 4  ;;  %p706_p8 = scmp.ne.s32.totalorder %s964_s0, %s705_s11  ;;  %s20_s8 = int_to_ptr.vmem [resolvable:$true] %s19_s8 }
  0x17   :  { %p709_p9 = scmp.lt.u32.totalorder %s705_s11, %s964_s0 }
  0x19   :  { %p711_p10 = pnand %p709_p9, %p706_p8 }
  0x1b   :  { %714 = shalt.err (!%p711_p10)
}
  0x1c   :  { %s715_s16 = scalar_lea.vmem %s20_s8, 32  ;;  %s719_s1 = scalar_lea.vmem %s20_s8, 256 }
  0x1d   :  { %p716_p11 = scmp.ne.s32.totalorder %s20_s8, %s715_s16  ;;  %p720_p12 = scmp.lt.s32.totalorder %s20_s8, %s20_s8 }
  0x1e   :  { %p721_p13 = scmp.lt.s32.totalorder %s719_s1, %s715_s16 }
  0x20   :  { %p722_p0 = por %p721_p13, %p720_p12 }
  0x22   :  { %p723_p1 = pnand %p722_p0, %p716_p11 }
  0x24   :  { %726 = shalt.err (!%p723_p1)
}
  0x25   :  { %s805_s17 = smov 32   ;;  %s806_s18 = smov 2  }
  0x26   :  { %25 = dma.hbm_to_vmem [thread:$0]  %s964_s0, 32, %s20_s8, [#allocation3], %s805_s17, %s805_s17, %s806_s18  }
  0x27   :  { %s807_s21 = smov [#allocation7]   ;;  %s808_s23 = smov [#allocation8]  }
  0x28   :  { %s43_s22 = sshll.u32 %s807_s21, 4  ;;  %s55_s24 = sshll.u32 %s808_s23, 4  ;;  %s44_s22 = int_to_ptr.vmem [resolvable:$true] %s43_s22  ;;  %s873_s24 = int_to_ptr.vmem [resolvable:$true] %s55_s24 }
  0x29   :  { %s727_s27 = scalar_lea.hbm %s966_s2, 1024 }
  0x2a   :  { %p728_p2 = scmp.ne.s32.totalorder %s966_s2, %s727_s27  ;;  %p731_p3 = scmp.lt.u32.totalorder %s727_s27, %s966_s2 }
  0x2c   :  { %p733_p4 = pnand %p731_p3, %p728_p2 }
  0x2e   :  { %736 = shalt.err (!%p733_p4)
}
  0x2f   :  { %s737_s0 = scalar_lea.vmem %s44_s22, 1024  ;;  %p742_p6 = scmp.lt.s32.totalorder %s44_s22, %s44_s22 }
  0x30   :  { %p738_p5 = scmp.ne.s32.totalorder %s44_s22, %s737_s0  ;;  %p743_p7 = scmp.lt.s32.totalorder %s737_s0, %s737_s0 }
  0x32   :  { %p744_p8 = por %p743_p7, %p742_p6 }
  0x34   :  { %p745_p9 = pnand %p744_p8, %p738_p5 }
  0x36   :  { %748 = shalt.err (!%p745_p9)
}
  0x37   :  { %49 = dma.hbm_to_vmem [thread:$0]  %s966_s2, 1024, %s44_s22, [#allocation6], %s802_s28, %s802_s28, %s803_s29  }
  0x38   :  { %s749_s13 = scalar_lea.hbm %s967_s3, 1024 }
  0x39   :  { %p750_p10 = scmp.ne.s32.totalorder %s967_s3, %s749_s13  ;;  %p753_p11 = scmp.lt.u32.totalorder %s749_s13, %s967_s3 }
  0x3b   :  { %p755_p12 = pnand %p753_p11, %p750_p10 }
  0x3d   :  { %758 = shalt.err (!%p755_p12)
}
  0x3e   :  { %s759_s17 = scalar_lea.vmem %s873_s24, 1024  ;;  %p764_p0 = scmp.lt.s32.totalorder %s873_s24, %s873_s24 }
  0x3f   :  { %p760_p13 = scmp.ne.s32.totalorder %s873_s24, %s759_s17  ;;  %p765_p1 = scmp.lt.s32.totalorder %s759_s17, %s759_s17 }
  0x41   :  { %p766_p2 = por %p765_p1, %p764_p0 }
  0x43   :  { %p767_p3 = pnand %p766_p2, %p760_p13 }
  0x45   :  { %770 = shalt.err (!%p767_p3)
}
  0x46   :  { %61 = dma.hbm_to_vmem [thread:$0]  %s967_s3, 1024, %s873_s24, [#allocation9], %s802_s28, %s802_s28, %s803_s29  }
  0x47   :  { %793 = dma.done.wait [#allocation3], 256  }
  0x48   :  { %794 = vsyncadd [#allocation3], 4294967040 }
  0x49   :  { %795 = dma.done.wait [#allocation6], 1536  }
  0x4a   :  { %796 = vsyncadd [#allocation6], 4294965760 }
  0x4b   :  { %797 = dma.done.wait [#allocation9], 1024  }
  0x4c   :  { %798 = vsyncadd [#allocation9], 4294966272  ;;  %v809_v0 = vmov 0.0   ;;  %vm810_vm0 = vmmov 0   ;;  %v639_v1 = vld [vmem:[#allocation5] sm:$0xff]   ;;  %v640_v2 = vld [vmem:[#allocation5 + $0x8] sm:$0xff]   ;;  %v89_v16 = vlaneseq }
  0x4d   :  { %572 = vmatprep.subr.bf16.mxu0 %v809_v0  ;;  %580 = vmatprep.mubr.msk.bf16.mxu0 %vm810_vm0, %v809_v0  ;;  %v641_v3 = vld [vmem:[#allocation5 + $0x10] sm:$0xff]   ;;  %vm117_vm1 = vcmask 523264   ;;  %v642_v4 = vld [vmem:[#allocation5 + $0x18] sm:$0xff]   ;;  %v643_v8 = vld [vmem:[#allocation7] sm:$0xff]  }
  0x4e   :  { %584 = vmatprep.subr.bf16.mxu1 %v809_v0  ;;  %600 = vmatprep.mubr.msk.bf16.mxu1 %vm810_vm0, %v809_v0  ;;  %v78_v5 = vld [vmem:[#allocation2] sm:$0xff]  ;;  %v79_v6 = vld [vmem:[#allocation2 + $0x8] sm:$0xff]  ;;  %v644_v9 = vld [vmem:[#allocation7 + $0x8] sm:$0xff]   ;;  %v929_v17 = vshrl.u32 %v89_v16, 7  ;;  %v811_v16 = vmov 0  }
  0x4f   :  { %573 = vmatpush3.bf16.msra.mxu0 %v639_v1  ;;  %v80_v7 = vpack.c.bf16 %v79_v6, %v78_v5  ;;  %585 = vmatpush3.bf16.msra.mxu1 %v643_v8  ;;  %v645_v10 = vld [vmem:[#allocation7 + $0x10] sm:$0xff]   ;;  %v646_v11 = vld [vmem:[#allocation7 + $0x18] sm:$0xff]   ;;  %v647_v12 = vld [vmem:[#allocation7 + $0x20] sm:$0xff]  }
  0x50   :  { %574 = vmatprep.subr.bf16.mxu0 %v809_v0  ;;  %586 = vmatprep.subr.bf16.mxu1 %v809_v0  ;;  %v648_v13 = vld [vmem:[#allocation7 + $0x28] sm:$0xff]   ;;  %v649_v14 = vld [vmem:[#allocation7 + $0x30] sm:$0xff]   ;;  %v650_v15 = vld [vmem:[#allocation7 + $0x38] sm:$0xff]   ;;  %v91_v18 = vsub.s32 0, %v929_v17  ;;  %v195_v46 = vsub.s32 1, %v929_v17  ;;  %v319_v1 = vsub.s32 2, %v929_v17 }
  0x51   :  { %v935_v19 = vld [vmem:[%s968_s4] sm:$0xf]  ;;  %v651_v38 = vld [vmem:[#allocation8] sm:$0xff]   ;;  %v653_v40 = vld [vmem:[#allocation8 + $0x10] sm:$0xff]  }
  0x52   :  { %v92_v20 = vrot.slane %v935_v19, %v91_v18  ;;  %v652_v39 = vld [vmem:[#allocation8 + $0x8] sm:$0xff]   ;;  %v654_v41 = vld [vmem:[#allocation8 + $0x18] sm:$0xff]   ;;  %v655_v42 = vld [vmem:[#allocation8 + $0x20] sm:$0xff]   ;;  %v196_v47 = vrot.slane %v935_v19, %v195_v46  ;;  %vm410_vm2 = vcmp.ne.f32.partialorder %v935_v19, 0.0 }
  0x53   :  { %575 = vmatpush3.bf16.msra.mxu0 %v640_v2  ;;  %587 = vmatpush3.bf16.msra.mxu1 %v644_v9  ;;  %v656_v43 = vld [vmem:[#allocation8 + $0x28] sm:$0xff]   ;;  %v657_v44 = vld [vmem:[#allocation8 + $0x30] sm:$0xff]   ;;  %v658_v45 = vld [vmem:[#allocation8 + $0x38] sm:$0xff]   ;;  %v320_v2 = vrot.slane %v935_v19, %v319_v1  ;;  %v423_v18 = vsel %vm410_vm2, 1, %v811_v16 }
  0x54   :  { %576 = vmatprep.subr.bf16.mxu0 %v809_v0  ;;  %588 = vmatprep.subr.bf16.mxu1 %v809_v0 }
  0x57   :  { %577 = vmatpush3.bf16.msra.mxu0 %v641_v3  ;;  %589 = vmatpush3.bf16.msra.mxu1 %v645_v10 }
  0x58   :  { %578 = vmatprep.subr.bf16.mxu0 %v809_v0  ;;  %590 = vmatprep.subr.bf16.mxu1 %v809_v0 }
  0x5b   :  { %579 = vmatpush3.bf16.msra.mxu0 %v642_v4  ;;  %591 = vmatpush3.bf16.msra.mxu1 %v646_v11 }
  0x5c   :  { %604 = vmatprep.subr.bf16.mxu0 %v809_v0  ;;  %592 = vmatprep.subr.bf16.mxu1 %v809_v0 }
  0x5e   :  { %581 = vmatmul.mubr.msk.bf16.vlgmr.msra.gmra.mrb[0].mxu0 %vm117_vm1, %v80_v7 }
  0x5f   :  { %620 = vmatprep.mubr.msk.bf16.mxu0 %vm810_vm0, %v809_v0  ;;  %593 = vmatpush3.bf16.msra.mxu1 %v647_v12 }
  0x60   :  { %594 = vmatprep.subr.bf16.mxu1 %v809_v0  ;;  %605 = vmatpush3.bf16.msra.mxu0 %v651_v38 }
  0x61   :  { %606 = vmatprep.subr.bf16.mxu0 %v809_v0 }
  0x63   :  { %595 = vmatpush3.bf16.msra.mxu1 %v648_v13 }
  0x64   :  { %596 = vmatprep.subr.bf16.mxu1 %v809_v0  ;;  %607 = vmatpush3.bf16.msra.mxu0 %v652_v39 }
  0x65   :  { %608 = vmatprep.subr.bf16.mxu0 %v809_v0 }
  0x67   :  { %597 = vmatpush3.bf16.msra.mxu1 %v649_v14 }
  0x68   :  { %598 = vmatprep.subr.bf16.mxu1 %v809_v0  ;;  %609 = vmatpush3.bf16.msra.mxu0 %v653_v40 }
  0x69   :  { %610 = vmatprep.subr.bf16.mxu0 %v809_v0 }
  0x6b   :  { %599 = vmatpush3.bf16.msra.mxu1 %v650_v15  ;;  %v426_v15 = vsub.s32 3, %v929_v17 }
  0x6c   :  { %611 = vmatpush3.bf16.msra.mxu0 %v654_v41 }
  0x6d   :  { %612 = vmatprep.subr.bf16.mxu0 %v809_v0 }
  0x70   :  { %613 = vmatpush3.bf16.msra.mxu0 %v655_v42 }
  0x71   :  { %614 = vmatprep.subr.bf16.mxu0 %v809_v0 }
  0x74   :  { %615 = vmatpush3.bf16.msra.mxu0 %v656_v43 }
  0x75   :  { %616 = vmatprep.subr.bf16.mxu0 %v809_v0 }
  0x78   :  { %617 = vmatpush3.bf16.msra.mxu0 %v657_v44 }
  0x79   :  { %618 = vmatprep.subr.bf16.mxu0 %v809_v0 }
  0x7c   :  { %619 = vmatpush3.bf16.msra.mxu0 %v658_v45 }
 0x131   :  { %v155_v21 = vpop.f32.mrb[0].mxu0 }
 0x132   :  { %v156_v22 = vadd.f32 %v155_v21, %v92_v20  ;;  %v582_v23 = vpop.f32.mrb[1].mxu0 }
 0x133   :  { %v158_v24 = vpop.f32.mrb[2].mxu0 }
 0x134   :  { %v522_v25 = vmul.f32 -1.442695, %v156_v22  ;;  %v159_v26 = vadd.f32 %v158_v24, %v92_v20  ;;  %v583_v27 = vpop.f32.mrb[3].mxu0  ;;  %v812_v20 = vmov 1966171168  }
 0x135   :  { %v435_v21 = vunpack.c.l.s4 %v812_v20 }
 0x136   :  { %659 = vpow2.f32 %v522_v25  ;;  %v523_v28 = vmul.f32 -1.442695, %v159_v26 }
 0x137   :  { %v436_v23 = vunpack.c.0.s8 %v435_v21 }
 0x138   :  { %661 = vpow2.f32 %v523_v28 }
 0x140   :  { %v660_v29 = vpop.eup %659 }
 0x141   :  { %v168_v30 = vadd.f32 1.0, %v660_v29 }
 0x142   :  { %v662_v31 = vpop.eup %661 }
 0x143   :  { %663 = vrcp.f32 %v168_v30  ;;  %v169_v32 = vadd.f32 1.0, %v662_v31 }
 0x145   :  { %665 = vrcp.f32 %v169_v32 }
 0x14d   :  { %v664_v33 = vpop.eup %663 }
 0x14e   :  { %v174_v35 = vmul.f32 %v664_v33, %v156_v22  ;;  %v427_v22 = vrot.slane %v423_v18, %v426_v15 }
 0x14f   :  { %v666_v34 = vpop.eup %665 }
 0x150   :  { %v175_v36 = vmul.f32 %v666_v34, %v159_v26  ;;  %vm428_vm3 = vcmp.eq.s32.totalorder %v427_v22, 1  ;;  %v439_v26 = vsub.s32 %v436_v23, %v929_v17 }
 0x152   :  { %v176_v37 = vpack.c.bf16 %v175_v36, %v174_v35 }
 0x154   :  { %601 = vmatmul.mubr.bf16.vlgmr.msra.gmra.mrb[0].mxu1 %v176_v37 }
 0x227   :  { %v279_v48 = vpop.f32.mrb[0].mxu1 }
 0x228   :  { %v280_v49 = vadd.f32 %v279_v48, %v196_v47  ;;  %v602_v50 = vpop.f32.mrb[1].mxu1 }
 0x229   :  { %v282_v51 = vpop.f32.mrb[2].mxu1 }
 0x22a   :  { %v532_v52 = vmul.f32 -1.442695, %v280_v49  ;;  %v283_v53 = vadd.f32 %v282_v51, %v196_v47  ;;  %v603_v54 = vpop.f32.mrb[3].mxu1 }
 0x22c   :  { %667 = vpow2.f32 %v532_v52  ;;  %v533_v55 = vmul.f32 -1.442695, %v283_v53 }
 0x22e   :  { %669 = vpow2.f32 %v533_v55 }
 0x236   :  { %v668_v56 = vpop.eup %667 }
 0x237   :  { %v292_v57 = vadd.f32 1.0, %v668_v56 }
 0x238   :  { %v670_v58 = vpop.eup %669 }
 0x239   :  { %671 = vrcp.f32 %v292_v57  ;;  %v293_v59 = vadd.f32 1.0, %v670_v58 }
 0x23b   :  { %673 = vrcp.f32 %v293_v59 }
 0x243   :  { %v672_v60 = vpop.eup %671 }
 0x244   :  { %v298_v62 = vmul.f32 %v672_v60, %v280_v49 }
 0x245   :  { %v674_v61 = vpop.eup %673 }
 0x246   :  { %v299_v63 = vmul.f32 %v674_v61, %v283_v53 }
 0x248   :  { %v300_v0 = vpack.c.bf16 %v299_v63, %v298_v62 }
 0x24a   :  { %621 = vmatmul.mubr.bf16.vlgmr.msra.gmra.mrb[4].mxu0 %v300_v0 }
 0x31d   :  { %v403_v3 = vpop.f32.mrb[4].mxu0 }
 0x31e   :  { %v404_v4 = vadd.f32 %v403_v3, %v320_v2  ;;  %v622_v5 = vpop.f32.mrb[5].mxu0 }
 0x31f   :  { %v406_v6 = vpop.f32.mrb[6].mxu0 }
 0x320   :  { %v542_v7 = vmul.f32 -1.442695, %v404_v4  ;;  %v407_v8 = vadd.f32 %v406_v6, %v320_v2  ;;  %v623_v9 = vpop.f32.mrb[7].mxu0 }
 0x322   :  { %675 = vpow2.f32 %v542_v7  ;;  %v543_v10 = vmul.f32 -1.442695, %v407_v8 }
 0x324   :  { %677 = vpow2.f32 %v543_v10 }
 0x32c   :  { %v676_v11 = vpop.eup %675 }
 0x32d   :  { %v417_v12 = vadd.f32 1.0, %v676_v11 }
 0x32e   :  { %v678_v13 = vpop.eup %677 }
 0x32f   :  { %679 = vrcp.f32 %v417_v12  ;;  %v418_v14 = vadd.f32 1.0, %v678_v13 }
 0x331   :  { %681 = vrcp.f32 %v418_v14 }
 0x339   :  { %v680_v24 = vpop.eup %679 }
 0x33a   :  { %v429_v27 = vsel %vm428_vm3, %v680_v24, %v404_v4 }
 0x33b   :  { %v682_v25 = vpop.eup %681 }
 0x33c   :  { %v430_v28 = vsel %vm428_vm3, %v682_v25, %v407_v8 }
 0x33d   :  { %v431_v29 = vpack.c.bf16 %v430_v28, %v429_v27  ;;  %v544_v19 = vpack.c.bf16 %v430_v28, %v430_v28 }
 0x33f   :  { %v440_v30 = vrot.slane %v431_v29, %v439_v26  ;;  %v447_v31 = vrot.slane %v544_v19, %v439_v26 }
 0x341   :  { %v448_v32 = vcombine.high %v440_v30, %v440_v30  ;;  %v449_v33 = vcombine.high %v447_v31, %v447_v31  ;;  %v456_v34 = vrot.slane %v440_v30, %v439_v26  ;;  %v463_v35 = vrot.slane %v447_v31, %v439_v26  ;;  %545 = vst.sshfl [vmem:[#allocation10] sm:$0x1 pattern:$0x73625140] %v440_v30 }
 0x342   :  { %547 = vst.sshfl [vmem:[#allocation10 + $0x4] sm:$0x1 pattern:$0x73625140] %v447_v31 }
 0x343   :  { %v470_v36 = vrot.slane %v448_v32, %v439_v26  ;;  %v477_v37 = vrot.slane %v449_v33, %v439_v26  ;;  %v478_v38 = vcombine.high %v456_v34, %v456_v34  ;;  %v479_v39 = vcombine.high %v463_v35, %v463_v35  ;;  %546 = vst.sshfl [vmem:[#allocation10 + $0x1] sm:$0x1 pattern:$0x73625140] %v448_v32 }
 0x344   :  { %548 = vst.sshfl [vmem:[#allocation10 + $0x5] sm:$0x1 pattern:$0x73625140] %v449_v33 }
 0x345   :  { %v480_v40 = vcombine.high %v470_v36, %v470_v36  ;;  %v481_v17 = vcombine.high %v477_v37, %v477_v37  ;;  %492 = vst [vmem:[#allocation10 + $0x2] sm:$0x1] %v478_v38  ;;  %496 = vst [vmem:[#allocation10 + $0x6] sm:$0x1] %v479_v39 }
 0x347   :  { %493 = vst [vmem:[#allocation10 + $0x3] sm:$0x1] %v480_v40  ;;  %497 = vst [vmem:[#allocation10 + $0x7] sm:$0x1] %v481_v17 }
 0x348   :  { %502 = vsyncadd [#allocation4], 112  ;;  %s813_s4 = smov [#allocation10]  }
 0x349   :  { %s503_s29 = sshll.u32 %s813_s4, 4  ;;  %s504_s29 = int_to_ptr.vmem [resolvable:$true] %s503_s29 }
 0x34a   :  { %s771_s19 = scalar_lea.vmem %s504_s29, 16  ;;  %s775_s20 = scalar_lea.vmem %s504_s29, 128 }
 0x34b   :  { %p772_p4 = scmp.ne.s32.totalorder %s504_s29, %s771_s19  ;;  %p776_p5 = scmp.lt.s32.totalorder %s504_s29, %s504_s29 }
 0x34c   :  { %p777_p6 = scmp.lt.s32.totalorder %s775_s20, %s771_s19 }
 0x34e   :  { %p778_p7 = por %p777_p6, %p776_p5 }
 0x350   :  { %p779_p8 = pnand %p778_p7, %p772_p4 }
 0x352   :  { %782 = shalt.err (!%p779_p8)
}
 0x353   :  { %s783_s23 = scalar_lea.hbm %s969_s5, 16 }
 0x354   :  { %p784_p9 = scmp.ne.s32.totalorder %s969_s5, %s783_s23  ;;  %p787_p10 = scmp.lt.u32.totalorder %s783_s23, %s969_s5 }
 0x356   :  { %p789_p11 = pnand %p787_p10, %p784_p9 }
 0x358   :  { %792 = shalt.err (!%p789_p11)
}
 0x359   :  { %s814_s30 = smov 16   ;;  %s815_s6 = smov 1  }
 0x35a   :  { %509 = dma.vmem_to_hbm [thread:$0]  %s504_s29, 16, %s969_s5, [#allocation4], %s814_s30, %s814_s30, %s815_s6  }
 0x35b   :  { %799 = dma.done.wait [#allocation4], 128  }
 0x35c   :  { %800 = vsyncadd [#allocation4], 4294967168 }
 0x35d   :  { %513 = vsyncpa [#allocation3], 1 }
 0x35e   :  { %514 = vsyncpa [#allocation6], 1 }
 0x35f   :  { %515 = vsyncpa [#allocation9], 1 }
 0x360   :  { %516 = vsyncpa [#allocation4], 1 }

</bundles_post_ra>
